<compile_context>
chip_gen: v7x
topology: tpu7x:2x2x1
jax: 0.10.0
libtpu: 0.0.40
codegen_flags: <defaults>
</compile_context>

<pallas_src>
import functools

import jax
import jax.numpy as jnp
from jax.experimental import pallas as pl
from jax.experimental.pallas import tpu as pltpu


def _pool1d_kernel(x_ref, o_ref, *, kernel_size, pad, mode, pad_val):
    # x_ref: (1, L, TC) input tile (channels on lanes)
    # o_ref: (1, L_out, TC) output tile
    L = x_ref.shape[1]
    L_out = o_ref.shape[1]
    TC = x_ref.shape[2]
    k = kernel_size

    if mode == "max":
        combine = jnp.maximum
        acc_dtype = x_ref.dtype
    else:  # "avg"
        combine = jnp.add
        acc_dtype = jnp.float32

    # One shifted (L_out, TC) term per window tap, read directly from the input
    # block.  Rows that fall in the (k-1)//2 halo are small constant blocks of
    # pad_val built in registers -- no padded VMEM scratch, no extra stores.
    terms = []
    for j in range(k):
        s = j - pad                    # shift of this window tap
        lo = max(0, -s)                # leading output rows covered by the halo
        hi = min(L_out, L - s)         # first trailing output row in the halo
        n = hi - lo                    # in-bounds rows for this tap
        if n <= 0:
            terms.append(jnp.full((L_out, TC), pad_val, acc_dtype))
            continue
        src = x_ref[0, pl.ds(lo + s, n), :].astype(acc_dtype)
        parts = []
        if lo > 0:
            parts.append(jnp.full((lo, TC), pad_val, acc_dtype))
        parts.append(src)
        if L_out - hi > 0:
            parts.append(jnp.full((L_out - hi, TC), pad_val, acc_dtype))
        terms.append(parts[0] if len(parts) == 1 else jnp.concatenate(parts, axis=0))

    # Log-depth pairwise reduction instead of a serial (k-1)-deep chain.
    # TODO(synk): for large kernel_size use a van Herk / Gil-Werman prefix+suffix
    # scheme so per-output work is O(1) in k.
    while len(terms) > 1:
        nxt = [combine(a, b) for a, b in zip(terms[0::2], terms[1::2])]
        if len(terms) % 2:
            nxt.append(terms[-1])
        terms = nxt
    acc = terms[0]

    if mode == "avg":
        acc = acc * (1.0 / k)          # count_include_pad=True (PyTorch default)
    o_ref[0, :, :] = acc.astype(o_ref.dtype)


def _tpu_budgets():
    """(block_target_bytes, vmem_limit_bytes) chosen per TPU generation."""
    try:
        vmem_bytes = int(pltpu.get_tpu_info().vmem_capacity_bytes)
    except Exception:
        vmem_bytes = 64 << 20          # conservative default (v7x-sized VMEM)
    if vmem_bytes >= (100 << 20):      # v5e / v6e: 128 MiB physical VMEM
        return 4 << 20, 64 << 20
    return 2 << 20, 32 << 20           # v7x: 64 MiB physical VMEM


def _choose_c_tile(L, C, itemsize, target_bytes):
    """Lane-dense channel tile (multiple of 128) sized to ~target_bytes blocks."""
    if C % 128 != 0:
        return C                       # only reached for small blocks (see pool1d)
    tc = (target_bytes // max(L * itemsize, 1)) // 128 * 128
    tc = int(min(max(tc, 128), C))
    while C % tc != 0:                 # make tiles divide C evenly
        tc -= 128
    return tc


def pool1d(x, kernel_size, mode):
    """x: (B, L, C). Returns pooled tensor of shape (B, L_out, C)."""
    mode = mode.lower()
    assert mode in ("max", "avg")
    # TODO(synk): avg on integer dtypes is undefined in PyTorch (AvgPool1d is
    # float-only); this kernel accumulates in f32 and truncates on the cast back.
    B, L, C = x.shape
    k = int(kernel_size)
    pad = (k - 1) // 2
    L_out = L + 2 * pad - k + 1
    assert L_out >= 1

    itemsize = jnp.dtype(x.dtype).itemsize
    target_bytes, vmem_limit = _tpu_budgets()

    if mode == "max":
        if jnp.issubdtype(x.dtype, jnp.floating):
            pad_val = float("-inf")
        else:
            pad_val = int(jnp.iinfo(x.dtype).min)
    else:
        pad_val = 0.0                  # matches count_include_pad=True

    # Lane density / VMEM bound: if C isn't a multiple of 128 and a single
    # (1, L, C) block would be large, pad channels up to the next 128 multiple
    # (pooling is channel-independent; padded lanes are sliced off below).
    xin, C_pad = x, C
    if C % 128 != 0 and L * C * itemsize > target_bytes:
        C_pad = ((C + 127) // 128) * 128
        xin = jnp.pad(x, ((0, 0), (0, 0), (0, C_pad - C)))

    TC = _choose_c_tile(L, C_pad, itemsize, target_bytes)

    kernel = functools.partial(
        _pool1d_kernel, kernel_size=k, pad=pad, mode=mode, pad_val=pad_val
    )

    # TODO(synk): for very long sequences add L tiling with a (k-1) halo
    # (pl.Element index map) so a single (1, L, TC) block stays within VMEM.
    out = pl.pallas_call(
        kernel,
        out_shape=jax.ShapeDtypeStruct((B, L_out, C_pad), x.dtype),
        grid=(B, C_pad // TC),
        in_specs=[pl.BlockSpec((1, L, TC), lambda b, c: (b, 0, c))],
        out_specs=pl.BlockSpec((1, L_out, TC), lambda b, c: (b, 0, c)),
        compiler_params=pltpu.CompilerParams(
            dimension_semantics=("parallel", "parallel"),
            vmem_limit_bytes=vmem_limit,
        ),
        cost_estimate=pl.CostEstimate(
            flops=(k - 1) * B * L_out * C_pad,
            transcendentals=0,
            bytes_accessed=(B * L * C_pad + B * L_out * C_pad) * itemsize,
        ),
    )(xin)

    if C_pad != C:
        out = out[:, :, :C]
    return out


def _ref_pool1d(x, kernel_size, mode):
    """Pure-JAX reference with PyTorch Pool1d semantics (for verification)."""
    B, L, C = x.shape
    pad = (kernel_size - 1) // 2
    L_out = L + 2 * pad - kernel_size + 1
    if mode == "max":
        pad_val = -jnp.inf if jnp.issubdtype(x.dtype, jnp.floating) else jnp.iinfo(x.dtype).min
    else:
        pad_val = 0
    xp = jnp.pad(x, ((0, 0), (pad, pad), (0, 0)), constant_values=pad_val)
    windows = jnp.stack([xp[:, j:j + L_out, :] for j in range(kernel_size)], axis=0)
    if mode == "max":
        return jnp.max(windows, axis=0)
    return (jnp.sum(windows.astype(jnp.float32), axis=0) / kernel_size).astype(x.dtype)


if __name__ == "__main__":
    key = jax.random.PRNGKey(0)
    k_small, k_big = jax.random.split(key)

    # Small shape implied by the module's forward: (batch, seq, hidden).
    x_small = jax.random.normal(k_small, (2, 8, 32), dtype=jnp.float32)
    # Larger lane-dense shape to exercise the multi-tile pipelined path.
    x_big = jax.random.normal(k_big, (2, 2048, 512), dtype=jnp.float32)

    cases = [
        (x_small, 3, "max"),
        (x_small, 3, "avg"),
        (x_small, 4, "avg"),   # even kernel -> L_out = L - 1 (matches PyTorch)
        (x_big, 5, "max"),
        (x_big, 3, "avg"),
    ]

    ok = True
    for x, k, mode in cases:
        out = jax.block_until_ready(pool1d(x, k, mode))
        ref = _ref_pool1d(x, k, mode)
        ok &= out.shape == ref.shape
        ok &= bool(jnp.allclose(out, ref, atol=1e-5, rtol=1e-5))

    if ok:
        print("KERNEL_OK")
</pallas_src>

<mosaic_0001>
module attributes {stable_mosaic.version = 11 : i64} {
  func.func @_pool1d_kernel(%arg0: i32, %arg1: i32, %arg2: memref<1x8x32xf32, #tpu.memory_space<vmem>>, %arg3: memref<1x8x32xf32, #tpu.memory_space<vmem>>) attributes {dimension_semantics = [#tpu.dimension_semantics<parallel>, #tpu.dimension_semantics<parallel>], iteration_bounds = array<i64: 2, 1>, scalar_prefetch = 0 : i64, scratch_operands = 0 : i64, tpu.core_type = #tpu.core_type<tc>, window_params = [{transform_indices = @transform_0, window_bounds = array<i64: 1, 8, 32>}, {transform_indices = @transform_1, window_bounds = array<i64: 1, 8, 32>}]} {
    %c0 = arith.constant 0 : index
    %c0_0 = arith.constant 0 : index
    %c0_1 = arith.constant 0 : index
    %0 = vector.load %arg2[%c0, %c0_0, %c0_1] : memref<1x8x32xf32, #tpu.memory_space<vmem>>, vector<1x7x32xf32>
    %1 = vector.shape_cast %0 : vector<1x7x32xf32> to vector<7x32xf32>
    %cst = arith.constant 0xFF800000 : f32
    %2 = vector.broadcast %cst : f32 to vector<1x32xf32>
    %3 = tpu.concatenate %2, %1 in 0 : vector<1x32xf32>, vector<7x32xf32> -> vector<8x32xf32>
    %c0_2 = arith.constant 0 : index
    %c0_3 = arith.constant 0 : index
    %c0_4 = arith.constant 0 : index
    %4 = vector.load %arg2[%c0_2, %c0_3, %c0_4] : memref<1x8x32xf32, #tpu.memory_space<vmem>>, vector<1x8x32xf32>
    %5 = vector.shape_cast %4 : vector<1x8x32xf32> to vector<8x32xf32>
    %c0_5 = arith.constant 0 : index
    %c1 = arith.constant 1 : index
    %c0_6 = arith.constant 0 : index
    %6 = vector.load %arg2[%c0_5, %c1, %c0_6] : memref<1x8x32xf32, #tpu.memory_space<vmem>>, vector<1x7x32xf32>
    %7 = vector.shape_cast %6 : vector<1x7x32xf32> to vector<7x32xf32>
    %cst_7 = arith.constant 0xFF800000 : f32
    %8 = vector.broadcast %cst_7 : f32 to vector<1x32xf32>
    %9 = tpu.concatenate %7, %8 in 0 : vector<7x32xf32>, vector<1x32xf32> -> vector<8x32xf32>
    %10 = arith.maximumf %3, %5 : vector<8x32xf32>
    %11 = arith.maximumf %10, %9 : vector<8x32xf32>
    %c0_8 = arith.constant 0 : index
    %c0_9 = arith.constant 0 : index
    %c0_10 = arith.constant 0 : index
    %12 = vector.load %arg3[%c0_8, %c0_9, %c0_10] : memref<1x8x32xf32, #tpu.memory_space<vmem>>, vector<1x8x32xf32>
    %13 = vector.shape_cast %12 : vector<1x8x32xf32> to vector<8x32xf32>
    %14 = vector.shape_cast %11 : vector<8x32xf32> to vector<1x8x32xf32>
    tpu.vector_store %arg3[%c0_8, %c0_9, %c0_10], %14 {strides = array<i32>} : memref<1x8x32xf32, #tpu.memory_space<vmem>>, vector<1x8x32xf32>,
    return
  }
  func.func @transform_0(%arg0: i32, %arg1: i32) -> (i32, i32, i32) {
    %c0_i32 = arith.constant 0 : i32
    %c0_i32_0 = arith.constant 0 : i32
    return %arg0, %c0_i32, %arg1 : i32, i32, i32
  }
  func.func @transform_1(%arg0: i32, %arg1: i32) -> (i32, i32, i32) {
    %c0_i32 = arith.constant 0 : i32
    %c0_i32_0 = arith.constant 0 : i32
    return %arg0, %c0_i32, %arg1 : i32, i32, i32
  }
}

</mosaic_0001>

<bundles_post_ra>
// kernel: tpu_custom_call.1
= control target key start
LH: loop header
LB: loop body
LE: loop exit
PB: predicated region body
PF: predicated region fallthrough
CT: control target
= control target key end

     0   :  { %6 = vsyncpa [#allocation3], 0  ;;  %s631_s0 = inlined_call_operand.hbm [shape: f32[2,8,32], index: 0, kind: input, shape index: {}]   ;;  %s632_s1 = inlined_call_operand.hbm [shape: f32[2,8,32], index: 1, kind: output, shape index: {}]  }
   0x1   :  { %8 = vsyncpa [#allocation3 + $0x1], 0 }
   0x2   :  { %9 = vsyncpa [#allocation4], 0 }
   0x3   :  { %11 = vsyncpa [#allocation4 + $0x1], 0  ;;  %s459_s6 = smov 0   ;;  %s461_s7 = smov 0  }
   0x4   :  { %s463_s8 = smov 0   ;;  %s465_s9 = smov 0  }
   0x5   :  { %s467_s10 = smov 0   ;;  %s469_s11 = smov 0  }
   0x6 LB: > { %s258_s12 = sadd.s32 4294967295, %s445_s11   ;;  %s259_s13 = sadd.s32 4294967294, %s445_s11   ;;  %s445_s11 = sphi %s469_s11, %s17_s11   ;;  %s441_s10 = sphi %s467_s10, %s648_s10   ;;  %s437_s9 = sphi %s465_s9, %s647_s9   ;;  %s433_s8 = sphi %s463_s8, %s646_s8   ;;  %s429_s7 = sphi %s461_s7, %s645_s7   ;;  %s425_s6 = sphi %s459_s6, %s644_s6  }
   0x7   : > { %s29_s14 = sadd.s32 1, %s441_s10  ;;  %s38_s15 = sadd.s32 1, %s433_s8 }
   0x8   : > { %p31_p0 = scmp.ge.s32.totalorder %s29_s14, 2  ;;  %p45_p1 = scmp.ne.s32.totalorder %s433_s8, %s429_s7 }
   0x9   : > { %p46_p2 = scmp.eq.s32.totalorder %s445_s11, 0  ;;  %p51_p3 = scmp.ne.s32.totalorder %s429_s7, %s425_s6 }
   0xa   : > { %s650_s14 = smov (%p31_p0, %s29_s14), 0  ;;  %p52_p5 = scmp.eq.s32.totalorder %s258_s12, 0 }
   0xb   : > { %p500_p4 = por %p46_p2, %p45_p1  ;;  %s33_s17 = ssub.s32 %s441_s10, %s650_s14 }
   0xc   : > { %p77_p6 = scmp.eq.s32.totalorder %s258_s12, 1  ;;  %p36_p7 = scmp.eq.s32.totalorder %s33_s17, 0 }
   0xd   : > { %p506_p8 = por %p52_p5, %p51_p3  ;;  %p83_p10 = scmp.eq.s32.totalorder %s259_s13, 1 }
   0xe   : > { %p510_p9 = por %p77_p6, %p45_p1  ;;  %p283_p13 = scmp.lt.s32.totalorder %s445_s11, 2 }
   0xf   : > { %s515_s20 = scalar_select %p36_p7, %s433_s8, %s38_s15  }
  0x10   : > { %s636_s19 = scalar_select %p510_p9, 1, 0 }
  0x11   : > { %p517_p11 = por %p83_p10, %p51_p3  ;;  %s103_s22 = sand.u32 1, %s433_s8  }
  0x12   : > { %s262_s23 = sshll.u32 %s103_s22, 3  ;;  %s263_s24 = sshll.u32 %s441_s10, 7 }
  0x13   : > { %s637_s21 = scalar_select %p517_p11, 1, 0 }
  0x14   : > { %s528_s27 = scalar_lea.hbm %s631_s0, %s263_s24  ;;  %s107_s28 = scalar_lea.vmem [#allocation2], %s262_s23 }
  0x15   : > { %s115_s29 = sshll.u32 %s107_s28, 4  ;;  %p534_p0 = pnand %p283_p13, %p500_p4  ;;  %s530_s29 = int_to_ptr.vmem [resolvable:$true] %s115_s29 }
  0x16   : > { %s104_s2 = scalar_lea.sflag [#allocation3], %s103_s22  ;;  %s333_s3 = scalar_lea.hbm %s528_s27, 128 }
  0x17   : > { %p334_p3 = scmp.ne.s32.totalorder %s528_s27, %s333_s3  ;;  %p335_p5 = pneg %p534_p0 }
  0x18   : > { %s338_s12 = scalar_lea.hbm %s631_s0, 256  ;;  %p339_p4 = scmp.lt.u32.totalorder %s528_s27, %s631_s0 }
  0x19   : > { %p336_p6 = pnand %p335_p5, %p334_p3  ;;  %p340_p10 = scmp.lt.u32.totalorder %s338_s12, %s333_s3 }
  0x1a   : > { %p342_p12 = scmp.lt.u32.totalorder %s333_s3, %s528_s27 }
  0x1b   : > { %p337_p7 = pneg %p336_p6  ;;  %p341_p13 = por %p340_p10, %p339_p4 }
  0x1d   : > { %p343_p1 = por %p342_p12, %p341_p13 }
  0x1f   : > { %p344_p2 = pnand %p343_p1, %p337_p7 }
  0x21   : > { %347 = shalt.err (!%p344_p2)
}
  0x22   : > { %s348_s16 = scalar_lea.vmem %s530_s29, 128  ;;  %s447_s17 = smov [#allocation2]  }
  0x23   : > { %p349_p3 = scmp.ne.s32.totalorder %s530_s29, %s348_s16  ;;  %s353_s22 = sshll.u32 %s447_s17, 4  ;;  %s354_s22 = int_to_ptr.vmem [resolvable:$false] %s353_s22 }
  0x24   : > { %s355_s23 = scalar_lea.vmem %s354_s22, 256  ;;  %p356_p9 = scmp.lt.s32.totalorder %s530_s29, %s354_s22 }
  0x25   : > { %p351_p6 = pnand %p349_p3, %p335_p5  ;;  %p357_p4 = scmp.lt.s32.totalorder %s355_s23, %s348_s16 }
  0x27   : > { %p352_p11 = pneg %p351_p6  ;;  %p358_p10 = por %p357_p4, %p356_p9 }
  0x29   : > { %p359_p12 = pnand %p358_p10, %p352_p11 }
  0x2b   : > { %362 = shalt.err (!%p359_p12)
}
  0x2c   : > { %278 = dma.hbm_to_vmem [thread:$0]  (!%p534_p0), %s528_s27, 128, %s530_s29, %s104_s2  }
  0x2d   : > { %p639_p1 = scmp.lt.s32.totalorder %s445_s11, 3  ;;  %p640_p2 = scmp.ge.s32.totalorder %s445_s11, 1 }
  0x2f   : > { %p121_p5 = pnand %p640_p2, %p639_p1 }
  0x30   : > { %s570_s24 = sand.u32 (!%p121_p5), 1, %s429_s7  }
  0x31   : > { %124 = sbr.rel (%p121_p5) target bundleno = 83 (0x53), region = 24  ;;  %s265_s25 = sshll.u32 (!%p121_p5), %s570_s24, 3 }
  0x32   : > { %s127_s26 = scalar_lea.sflag (!%p121_p5), [#allocation3], %s570_s24  ;;  %s130_s28 = scalar_lea.vmem (!%p121_p5), [#allocation2], %s265_s25 }
  0x38   : > { %416 = dma.done.wait (%p506_p8), %s127_s26, 128  }
  0x39   : > { %418 = vsyncadd (%p506_p8), %s127_s26, 4294967168  ;;  %v149_v0 = vld [vmem:[%s130_s28] sm:$0x7f]  ;;  %vm153_vm0 = vcmask 1040384   ;;  %vm157_vm1 = vcmask 1046528   ;;  %s148_s27 = scalar_lea.vmem [#allocation5], %s265_s25 }
  0x3a   : > { %v156_v1 = vld [vmem:[%s130_s28 + $0x1] sm:$0x7f]  ;;  %v151_v2 = vrot.slane %v149_v0, 7  ;;  %s178_s29 = sshll.u32 %s148_s27, 4  ;;  %s268_s30 = sshll.u32 %s437_s9, 7  ;;  %vm161_vm2 = vcmask 261120   ;;  %s579_s29 = int_to_ptr.vmem [resolvable:$true] %s178_s29 }
  0x3b   : > { %v155_v3 = vld [vmem:[%s130_s28] sm:$0xff]  ;;  %v158_v5 = vsel %vm157_vm1, %v156_v1, -inf  ;;  %s584_s3 = scalar_lea.hbm %s632_s1, %s268_s30  ;;  %s164_s4 = scalar_lea.sflag [#allocation4], %s570_s24 }
  0x3c   : > { %v154_v4 = vsel %vm153_vm0, -inf, %v151_v2  ;;  %s363_s5 = scalar_lea.vmem %s579_s29, 128  ;;  %p641_p9 = scmp.ne.s32.totalorder %s636_s19, 0 }
  0x3d   : > { %v159_v6 = vmax.f32 %v154_v4, %v155_v3  ;;  %p364_p8 = scmp.ne.s32.totalorder %s579_s29, %s363_s5  ;;  %s448_s9 = smov [#allocation5]  }
  0x3e   : > { %s367_s12 = sshll.u32 %s448_s9, 4  ;;  %s368_s12 = int_to_ptr.vmem [resolvable:$false] %s367_s12 }
  0x3f   : > { %v160_v7 = vmax.f32 %v159_v6, %v158_v5  ;;  %p365_p11 = pnand %p364_p8, %p641_p9  ;;  %s369_s13 = scalar_lea.vmem %s368_s12, 256 }
  0x40   : > { %p370_p7 = scmp.lt.s32.totalorder %s579_s29, %s368_s12  ;;  %p371_p13 = scmp.lt.s32.totalorder %s369_s13, %s363_s5 }
  0x41   : > { %162 = vst.msk [vmem:[%s148_s27] sm:$0xff] %vm161_vm2, %v160_v7  ;;  %p366_p0 = pneg %p365_p11 }
  0x42   : > { %p372_p3 = por %p371_p13, %p370_p7 }
  0x44   : > { %p373_p6 = pnand %p372_p3, %p366_p0 }
  0x46   : > { %376 = shalt.err (!%p373_p6)
}
  0x47   : > { %s377_s15 = scalar_lea.hbm %s584_s3, 128  ;;  %s381_s22 = scalar_lea.hbm %s632_s1, 256 }
  0x48   : > { %p378_p4 = scmp.ne.s32.totalorder %s584_s3, %s377_s15  ;;  %p382_p1 = scmp.lt.u32.totalorder %s584_s3, %s632_s1 }
  0x49   : > { %p383_p2 = scmp.lt.u32.totalorder %s381_s22, %s377_s15  ;;  %p385_p8 = scmp.lt.u32.totalorder %s377_s15, %s584_s3 }
  0x4a   : > { %p379_p10 = pnand %p378_p4, %p641_p9 }
  0x4b   : > { %p384_p5 = por %p383_p2, %p382_p1 }
  0x4c   : > { %p380_p12 = pneg %p379_p10 }
  0x4d   : > { %p386_p11 = por %p385_p8, %p384_p5 }
  0x4f   : > { %p387_p0 = pnand %p386_p11, %p380_p12 }
  0x51   : > { %390 = shalt.err (!%p387_p0)
}
  0x52   : > { %273 = dma.vmem_to_hbm [thread:$0]  (%p641_p9), %s579_s29, 128, %s584_s3, %s164_s4  }
  0x53 PF: > { %s190_s25 = sand.u32 1, %s425_s6   ;;  %p642_p7 = scmp.ne.s32.totalorder %s637_s21, 0 }
  0x54   : > { %p643_p13 = scmp.ge.s32.totalorder %s445_s11, 2  ;;  %s191_s26 = scalar_lea.sflag [#allocation4], %s190_s25 }
  0x56   : > { %p280_p3 = pnand %p643_p13, %p642_p7 }
  0x58   : > { %420 = dma.done.wait (!%p280_p3), %s191_s26, 128  }
  0x59   : > { %422 = vsyncadd (!%p280_p3), %s191_s26, 4294967168  ;;  %s17_s11 = sadd.s32 1, %s445_s11   ;;  %s644_s6 = smov %s429_s7 }
  0x5a   : > { %p14_p6 = scmp.ge.s32.totalorder %s17_s11, 4   ;;  %s645_s7 = smov %s433_s8 }
  0x5b   : > { %s646_s8 = smov %s515_s20  ;;  %s647_s9 = smov %s441_s10 }
  0x5c   : > { %s648_s10 = smov %s650_s14  ;;  %16 = sbr.rel (!%p14_p6) target bundleno = 6 (0x6), region = 69 }
  0x63   :  { %196 = vsyncpa [#allocation3], 1 }
  0x64   :  { %198 = vsyncpa [#allocation3 + $0x1], 1 }
  0x65   :  { %199 = vsyncpa [#allocation4], 1 }
  0x66   :  { %201 = vsyncpa [#allocation4 + $0x1], 1 }

</bundles_post_ra>
